<compile_context>
chip_gen: v7x
topology: tpu7x:2x2x1
jax: 0.10.0
libtpu: 0.0.40
codegen_flags: <defaults>
</compile_context>

<pallas_src>
import functools

import jax
import jax.numpy as jnp
from jax.experimental import pallas as pl
from jax.experimental.pallas import tpu as pltpu


def _round_up(v, m):
    return ((v + m - 1) // m) * m


def _mh_conf_kernel(x_ref, w_ref, b_ref, doa_ref, conf_ref, *, p_doa):
    # x_ref: [TILE_N, D] (caller dtype)   w_ref: [D, P] (param dtype)   b_ref: [1, P] f32
    # doa_ref: [TILE_N, p_doa]            conf_ref: [TILE_N, P - p_doa]
    y = jnp.dot(x_ref[...], w_ref[...],
                preferred_element_type=jnp.float32,
                precision=jax.lax.Precision.HIGHEST) + b_ref[...]
    # DOA columns pass through untouched (slice at a 128-lane boundary -> no copy).
    doa_ref[...] = y[:, :p_doa].astype(doa_ref.dtype)
    # Exact sigmoid via one EUP tanh, restricted to the trailing 128-lane conf group.
    z = y[:, p_doa:]
    conf_ref[...] = (0.5 * (jnp.tanh(0.5 * z) + 1.0)).astype(conf_ref.dtype)


def prepare_fused_params(w_doa, b_doa, w_conf, b_conf, param_dtype=None):
    """Fuse the K DOA heads and K confidence heads into one lane-dense weight/bias.

    w_doa: [D, K*output_dim], b_doa: [K*output_dim], w_conf: [D, K], b_conf: [K].
    Returns (w_fused [D, P_doa+P_conf], b_fused [1, P_doa+P_conf] f32, p_doa, p_conf).
    Call once at init (outside the per-step forward path).
    """
    d, doa_width = w_doa.shape
    k = w_conf.shape[1]
    p_doa = _round_up(doa_width, 128)   # DOA columns: leading 128-lane group(s)
    p_conf = _round_up(k, 128)          # conf columns: own trailing 128-lane group
    param_dtype = param_dtype if param_dtype is not None else w_doa.dtype

    w_fused = jnp.zeros((d, p_doa + p_conf), jnp.float32)
    w_fused = w_fused.at[:, :doa_width].set(w_doa.astype(jnp.float32))
    w_fused = w_fused.at[:, p_doa:p_doa + k].set(w_conf.astype(jnp.float32))
    b_fused = jnp.zeros((1, p_doa + p_conf), jnp.float32)
    b_fused = b_fused.at[0, :doa_width].set(b_doa.astype(jnp.float32))
    b_fused = b_fused.at[0, p_doa:p_doa + k].set(b_conf.astype(jnp.float32))
    # Weights take the compute dtype (bf16 halves the resident-weight DMA on bf16 models);
    # the bias stays f32 since the accumulate is f32.
    return w_fused.astype(param_dtype), b_fused, p_doa, p_conf


def _choose_tile_n(n, d, p_total, in_bytes, out_bytes, vmem_budget_bytes=24 << 20):
    """Largest row tile (multiple of 8, <=4096) whose double-buffered x + outputs fit the
    budget, additionally capped so the 1-D row grid keeps ~4 steps (megacore + pipelining)."""
    per_row = 2 * (d * in_bytes + p_total * out_bytes)
    budget_rows = max(8, (vmem_budget_bytes // per_row) // 8 * 8)
    multi_step = max(8, _round_up(pl.cdiv(n, 4), 8))
    return max(8, min(4096, budget_rows, multi_step))


def mh_conf_localization_output(x, w_fused, b_fused, num_hypothesis, output_dim,
                                p_doa, p_conf):
    """x: [batch, T, D]; w_fused/b_fused from prepare_fused_params.

    Returns (hyp_stacked [batch,T,K,output_dim], conf_stacked [batch,T,K,1]).
    """
    batch, T, D = x.shape
    N = batch * T
    K = num_hypothesis
    doa_width = K * output_dim
    P = p_doa + p_conf

    x2d = x.reshape(N, D)                      # no pad, no dtype cast
    in_bytes = x.dtype.itemsize
    out_bytes = x.dtype.itemsize
    w_bytes = w_fused.dtype.itemsize

    TILE_N = _choose_tile_n(N, D, P, in_bytes, out_bytes)
    grid = (pl.cdiv(N, TILE_N),)               # ragged tail handled by Pallas block masking

    # True double-buffered footprint (streamed x + both output slabs, resident W + bias
    # counted twice since pipeline buffers are allocated per operand) + slack.
    vmem_bytes = (2 * TILE_N * (D * in_bytes + P * out_bytes)
                  + 2 * (D * P * w_bytes + P * 4)
                  + (8 << 20))

    cost = pl.CostEstimate(
        flops=2 * N * D * P,
        transcendentals=N * p_conf,
        bytes_accessed=N * D * in_bytes + N * P * out_bytes + D * P * w_bytes + P * 4,
    )

    kernel = functools.partial(_mh_conf_kernel, p_doa=p_doa)

    doa2d, conf2d = pl.pallas_call(
        kernel,
        out_shape=(jax.ShapeDtypeStruct((N, p_doa), x.dtype),
                   jax.ShapeDtypeStruct((N, p_conf), x.dtype)),
        grid_spec=pltpu.PrefetchScalarGridSpec(
            num_scalar_prefetch=0,
            grid=grid,
            in_specs=[
                pl.BlockSpec((TILE_N, D), lambda i: (i, 0)),   # streamed rows
                pl.BlockSpec((D, P), lambda i: (0, 0)),        # resident fused weight
                pl.BlockSpec((1, P), lambda i: (0, 0)),        # resident fused bias (f32)
            ],
            out_specs=[
                pl.BlockSpec((TILE_N, p_doa), lambda i: (i, 0)),
                pl.BlockSpec((TILE_N, p_conf), lambda i: (i, 0)),
            ],
        ),
        compiler_params=pltpu.CompilerParams(
            dimension_semantics=("parallel",),
            vmem_limit_bytes=int(vmem_bytes),
        ),
        cost_estimate=cost,
    )(x2d, w_fused, b_fused)

    hyp_stacked = doa2d[:, :doa_width].reshape(batch, T, K, output_dim)
    conf_stacked = conf2d[:, :K].reshape(batch, T, K, 1)
    return hyp_stacked, conf_stacked


def init_params(key, input_dim, num_hypothesis, output_dim):
    """Deterministic init mimicking PyTorch nn.Linear default (uniform +/- 1/sqrt(in))."""
    bound = 1.0 / jnp.sqrt(jnp.float32(input_dim))
    keys = jax.random.split(key, 4 * num_hypothesis)
    w_doa, b_doa, w_conf, b_conf = [], [], [], []
    for k in range(num_hypothesis):
        kw, kb, kcw, kcb = keys[4 * k:4 * k + 4]
        # PyTorch stores [out, in]; we keep [in, out] for the kernel (x @ W).
        w_doa.append(jax.random.uniform(kw, (input_dim, output_dim),
                                        jnp.float32, -bound, bound))
        b_doa.append(jax.random.uniform(kb, (output_dim,),
                                        jnp.float32, -bound, bound))
        w_conf.append(jax.random.uniform(kcw, (input_dim, 1),
                                         jnp.float32, -bound, bound))
        b_conf.append(jax.random.uniform(kcb, (1,),
                                         jnp.float32, -bound, bound))
    W_doa = jnp.concatenate(w_doa, axis=1)          # [D, K*output_dim]
    B_doa = jnp.concatenate(b_doa, axis=0)          # [K*output_dim]
    W_conf = jnp.concatenate(w_conf, axis=1)        # [D, K]
    B_conf = jnp.concatenate(b_conf, axis=0)        # [K]
    return W_doa, B_doa, W_conf, B_conf


def reference(x, W_doa, B_doa, W_conf, B_conf, K, output_dim):
    batch, T, D = x.shape
    x2d = x.reshape(-1, D)
    doa = x2d @ W_doa + B_doa
    conf = jax.nn.sigmoid(x2d @ W_conf + B_conf)
    return doa.reshape(batch, T, K, output_dim), conf.reshape(batch, T, K, 1)


if __name__ == "__main__":
    batch, T, D = 2, 8, 32
    K, output_dim = 4, 2

    key = jax.random.PRNGKey(0)
    kx, kp = jax.random.split(key)
    x = jax.random.normal(kx, (batch, T, D), jnp.float32)
    W_doa, B_doa, W_conf, B_conf = init_params(kp, D, K, output_dim)

    # Fuse + pad once at init (kept f32 here to match the f32 PyTorch reference tightly;
    # pass param_dtype=jnp.bfloat16 for bf16 models to halve the weight DMA).
    w_fused, b_fused, p_doa, p_conf = prepare_fused_params(W_doa, B_doa, W_conf, B_conf)

    hyp, conf = mh_conf_localization_output(x, w_fused, b_fused, K, output_dim,
                                            p_doa, p_conf)
    hyp = jax.block_until_ready(hyp)
    conf = jax.block_until_ready(conf)

    hyp_ref, conf_ref = reference(x, W_doa, B_doa, W_conf, B_conf, K, output_dim)
    assert hyp.shape == (batch, T, K, output_dim)
    assert conf.shape == (batch, T, K, 1)
    # DOA: f32 matmul with pinned HIGHEST precision; conf: exact tanh-form sigmoid.
    assert jnp.allclose(hyp, hyp_ref, atol=1e-4, rtol=1e-4)
    assert jnp.allclose(conf, conf_ref, atol=1e-4, rtol=1e-4)

    print("KERNEL_OK")
</pallas_src>

<mosaic_0001>
module attributes {stable_mosaic.version = 11 : i64} {
  func.func @_mh_conf_kernel(%arg0: i32, %arg1: memref<8x32xf32, #tpu.memory_space<vmem>>, %arg2: memref<32x256xf32, #tpu.memory_space<vmem>>, %arg3: memref<1x256xf32, #tpu.memory_space<vmem>>, %arg4: memref<8x128xf32, #tpu.memory_space<vmem>>, %arg5: memref<8x128xf32, #tpu.memory_space<vmem>>) attributes {dimension_semantics = [#tpu.dimension_semantics<parallel>], iteration_bounds = array<i64: 2>, scalar_prefetch = 0 : i64, scratch_operands = 0 : i64, tpu.core_type = #tpu.core_type<tc>, window_params = [{transform_indices = @transform_0, window_bounds = array<i64: 8, 32>}, {pipeline_mode = #tpu.pipeline_mode<synchronous>, transform_indices = @transform_1, window_bounds = array<i64: 32, 256>}, {pipeline_mode = #tpu.pipeline_mode<synchronous>, transform_indices = @transform_2, window_bounds = array<i64: 1, 256>}, {transform_indices = @transform_3, window_bounds = array<i64: 8, 128>}, {transform_indices = @transform_4, window_bounds = array<i64: 8, 128>}]} {
    %c0 = arith.constant 0 : index
    %c0_0 = arith.constant 0 : index
    %0 = vector.load %arg1[%c0, %c0_0] : memref<8x32xf32, #tpu.memory_space<vmem>>, vector<8x32xf32>
    %c0_1 = arith.constant 0 : index
    %c0_2 = arith.constant 0 : index
    %1 = vector.load %arg2[%c0_1, %c0_2] : memref<32x256xf32, #tpu.memory_space<vmem>>, vector<32x256xf32>
    %cst = arith.constant dense<0.000000e+00> : vector<8x256xf32>
    %2 = tpu.matmul %0, %1, %cst {dimension_numbers = #tpu.dot_dimension_numbers<[1], [0], [0], [1], [0, 0, 1, 1], [], []>, precision = #tpu.contract_precision<fp32>} : vector<8x32xf32>, vector<32x256xf32>, vector<8x256xf32> -> vector<8x256xf32>
    %c0_3 = arith.constant 0 : index
    %c0_4 = arith.constant 0 : index
    %3 = vector.load %arg3[%c0_3, %c0_4] : memref<1x256xf32, #tpu.memory_space<vmem>>, vector<1x256xf32>
    %4 = vector.broadcast %3 : vector<1x256xf32> to vector<8x256xf32>
    %5 = arith.addf %2, %4 : vector<8x256xf32>
    %6 = vector.extract_strided_slice %5 {offsets = [0, 0], sizes = [8, 128], strides = [1, 1]} : vector<8x256xf32> to vector<8x128xf32>
    %c0_5 = arith.constant 0 : index
    %c0_6 = arith.constant 0 : index
    %7 = vector.load %arg4[%c0_5, %c0_6] : memref<8x128xf32, #tpu.memory_space<vmem>>, vector<8x128xf32>
    tpu.vector_store %arg4[%c0_5, %c0_6], %6 {strides = array<i32>} : memref<8x128xf32, #tpu.memory_space<vmem>>, vector<8x128xf32>,
    %8 = vector.extract_strided_slice %5 {offsets = [0, 128], sizes = [8, 128], strides = [1, 1]} : vector<8x256xf32> to vector<8x128xf32>
    %cst_7 = arith.constant 5.000000e-01 : f32
    %9 = vector.broadcast %cst_7 : f32 to vector<8x128xf32>
    %10 = arith.mulf %9, %8 : vector<8x128xf32>
    %11 = math.tanh %10 : vector<8x128xf32>
    %cst_8 = arith.constant 1.000000e+00 : f32
    %12 = vector.broadcast %cst_8 : f32 to vector<8x128xf32>
    %13 = arith.addf %11, %12 : vector<8x128xf32>
    %cst_9 = arith.constant 5.000000e-01 : f32
    %14 = vector.broadcast %cst_9 : f32 to vector<8x128xf32>
    %15 = arith.mulf %14, %13 : vector<8x128xf32>
    %c0_10 = arith.constant 0 : index
    %c0_11 = arith.constant 0 : index
    %16 = vector.load %arg5[%c0_10, %c0_11] : memref<8x128xf32, #tpu.memory_space<vmem>>, vector<8x128xf32>
    tpu.vector_store %arg5[%c0_10, %c0_11], %15 {strides = array<i32>} : memref<8x128xf32, #tpu.memory_space<vmem>>, vector<8x128xf32>,
    return
  }
  func.func @transform_0(%arg0: i32) -> (i32, i32) {
    %c0_i32 = arith.constant 0 : i32
    %c0_i32_0 = arith.constant 0 : i32
    return %arg0, %c0_i32 : i32, i32
  }
  func.func @transform_1(%arg0: i32) -> (i32, i32) {
    %c0_i32 = arith.constant 0 : i32
    %c0_i32_0 = arith.constant 0 : i32
    %c0_i32_1 = arith.constant 0 : i32
    return %c0_i32, %c0_i32_0 : i32, i32
  }
  func.func @transform_2(%arg0: i32) -> (i32, i32) {
    %c0_i32 = arith.constant 0 : i32
    %c0_i32_0 = arith.constant 0 : i32
    %c0_i32_1 = arith.constant 0 : i32
    return %c0_i32, %c0_i32_0 : i32, i32
  }
  func.func @transform_3(%arg0: i32) -> (i32, i32) {
    %c0_i32 = arith.constant 0 : i32
    %c0_i32_0 = arith.constant 0 : i32
    return %arg0, %c0_i32 : i32, i32
  }
  func.func @transform_4(%arg0: i32) -> (i32, i32) {
    %c0_i32 = arith.constant 0 : i32
    %c0_i32_0 = arith.constant 0 : i32
    return %arg0, %c0_i32 : i32, i32
  }
}

</mosaic_0001>

<bundles_post_ra>
// kernel: tpu_custom_call.1
= control target key start
LH: loop header
LB: loop body
LE: loop exit
PB: predicated region body
PF: predicated region fallthrough
CT: control target
= control target key end

     0   :  { %10 = vsyncpa [#allocation3], 0  ;;  %s1605_s0 = inlined_call_operand.hbm [shape: f32[16,32], index: 0, kind: input, shape index: {}]   ;;  %s1606_s1 = inlined_call_operand.hbm [shape: f32[32,256], index: 1, kind: input, shape index: {}]   ;;  %s1607_s2 = inlined_call_operand.vmem [shape: f32[1,256], index: 2, kind: input, shape index: {}]   ;;  %s1608_s3 = inlined_call_operand.hbm [shape: f32[16,128], index: 3, kind: output, shape index: {0}]   ;;  %s1609_s4 = inlined_call_operand.hbm [shape: f32[16,128], index: 4, kind: output, shape index: {1}]  }
   0x1   :  { %12 = vsyncpa [#allocation3 + $0x1], 0 }
   0x2   :  { %13 = vsyncpa [#allocation6], 0 }
   0x3   :  { %14 = vsyncpa [#allocation4], 0 }
   0x4   :  { %16 = vsyncpa [#allocation4 + $0x1], 0 }
   0x5   :  { %17 = vsyncpa [#allocation9], 0 }
   0x6   :  { %19 = vsyncpa [#allocation9 + $0x1], 0  ;;  %s1295_s15 = smov 0   ;;  %s1297_s16 = smov 0  }
   0x7   :  { %s1299_s17 = smov 0   ;;  %s1301_s18 = smov 0  }
   0x8 LB: > { %s1316_s19 = sadd.s32 4294967295, %s1261_s18   ;;  %s957_s20 = sadd.s32 4294967294, %s1261_s18   ;;  %s1261_s18 = sphi %s1301_s18, %s1629_s18   ;;  %s1257_s17 = sphi %s1299_s17, %s1628_s17   ;;  %s1253_s16 = sphi %s1297_s16, %s1627_s16   ;;  %s1249_s15 = sphi %s1295_s15, %s1626_s15  }
   0x9   : > { %p45_p0 = scmp.ne.s32.totalorder %s1253_s16, %s1249_s15  ;;  %p1610_p1 = scmp.eq.s32.totalorder %s1316_s19, 0 }
   0xa   : > { %p117_p3 = scmp.eq.s32.totalorder %s957_s20, 1  ;;  %p958_p5 = scmp.ge.s32.totalorder %s1261_s18, 1 }
   0xb   : > { %p1325_p4 = por %p1610_p1, %p45_p0  ;;  %p150_p7 = scmp.lt.s32.totalorder %s1261_s18, 3 }
   0xc   : > { %p1330_p6 = por %p117_p3, %p45_p0  ;;  %s1263_s24 = smov [#allocation5]  }
   0xd   : > { %s1613_s21 = scalar_select %p1325_p4, 1, 0 }
   0xe   : > { %s1614_s22 = scalar_select %p1330_p6, 1, 0 }
   0xf   : > { %p1335_p8 = pnand %p958_p5, %p150_p7  ;;  %s162_s25 = sshll.u32 %s1263_s24, 4  ;;  %s1339_s25 = int_to_ptr.vmem [resolvable:$true] %s162_s25 }
  0x10   : > { %s1351_s27 = sadd.s32 1, %s1261_s18   ;;  %s32_s28 = sadd.s32 1, %s1257_s17 }
  0x11   : > { %s1615_s23 = scalar_select %p1335_p8, 1, 0 }
  0x12   : > { %p1044_p9 = pneg %p1335_p8  ;;  %s29_s29 = ssub.s32 %s1261_s18, %s1351_s27 }
  0x13   : > { %s1101_s6 = scalar_lea.hbm %s1606_s1, 1024 }
  0x14   : > { %p1346_p11 = pnand %p1044_p9, %p1610_p1  ;;  %p1102_p12 = scmp.ne.s32.totalorder %s1606_s1, %s1101_s6 }
  0x15   : > { %p1108_p5 = scmp.lt.u32.totalorder %s1101_s6, %s1606_s1 }
  0x16   : > { %p1103_p13 = pneg %p1346_p11 }
  0x18   : > { %p1104_p0 = pnand %p1103_p13, %p1102_p12 }
  0x1a   : > { %p1105_p3 = pneg %p1104_p0 }
  0x1c   : > { %p1110_p7 = pnand %p1108_p5, %p1105_p3 }
  0x1e   : > { %1113 = shalt.err (!%p1110_p7)
}
  0x1f   : > { %s1114_s11 = scalar_lea.vmem %s1339_s25, 1024  ;;  %p1122_p2 = scmp.lt.s32.totalorder %s1339_s25, %s1339_s25 }
  0x20   : > { %p1115_p9 = scmp.ne.s32.totalorder %s1339_s25, %s1114_s11  ;;  %p1123_p6 = scmp.lt.s32.totalorder %s1114_s11, %s1114_s11 }
  0x22   : > { %p1117_p10 = pnand %p1115_p9, %p1103_p13  ;;  %p1124_p4 = por %p1123_p6, %p1122_p2 }
  0x24   : > { %p1118_p1 = pneg %p1117_p10 }
  0x26   : > { %p1125_p8 = pnand %p1124_p4, %p1118_p1 }
  0x28   : > { %1128 = shalt.err (!%p1125_p8)
}
  0x29   : > { %s1264_s12 = smov 256   ;;  %s1265_s13 = smov 16  }
  0x2a   : > { %1047 = dma.hbm_to_vmem [thread:$0]  (!%p1346_p11), %s1606_s1, 1024, %s1339_s25, [#allocation6], %s1264_s12, %s1264_s12, %s1265_s13  }
  0x2b   : > { %p30_p2 = scmp.eq.s32.totalorder %s29_s29, 0  ;;  %p39_p1 = scmp.ne.s32.totalorder %s1257_s17, %s1253_s16 }
  0x2c   : > { %p40_p4 = scmp.eq.s32.totalorder %s1261_s18, 0  ;;  %p1060_p6 = scmp.lt.s32.totalorder %s1261_s18, 2 }
  0x2d   : > { %s1382_s24 = scalar_select %p30_p2, %s1257_s17, %s32_s28  }
  0x2e   : > { %p41_p8 = por %p40_p4, %p39_p1  ;;  %p1617_p10 = scmp.eq.s32.totalorder %s1316_s19, 1 }
  0x2f   : > { %s179_s5 = sand.u32 1, %s1257_s17   ;;  %s962_s6 = sshll.u32 %s1261_s18, 7 }
  0x30   : > { %p1386_p12 = por %p1617_p10, %p39_p1  ;;  %s961_s7 = sshll.u32 %s179_s5, 3 }
  0x31   : > { %s1395_s9 = scalar_lea.hbm %s1605_s0, %s962_s6  ;;  %s183_s25 = scalar_lea.vmem [#allocation2], %s961_s7 }
  0x32   : > { %s190_s28 = sshll.u32 %s183_s25, 4  ;;  %p1397_p11 = pnand %p1060_p6, %p41_p8  ;;  %s1401_s28 = int_to_ptr.vmem [resolvable:$true] %s190_s28 }
  0x33   : > { %s180_s10 = scalar_lea.sflag [#allocation3], %s179_s5  ;;  %s1129_s11 = scalar_lea.hbm %s1395_s9, 128 }
  0x34   : > { %p1130_p13 = scmp.ne.s32.totalorder %s1395_s9, %s1129_s11  ;;  %p1131_p0 = pneg %p1397_p11 }
  0x35   : > { %s1134_s14 = scalar_lea.hbm %s1605_s0, 256  ;;  %p1135_p7 = scmp.lt.u32.totalorder %s1395_s9, %s1605_s0 }
  0x36   : > { %p1132_p3 = pnand %p1131_p0, %p1130_p13  ;;  %p1136_p9 = scmp.lt.u32.totalorder %s1134_s14, %s1129_s11 }
  0x37   : > { %p1138_p1 = scmp.lt.u32.totalorder %s1129_s11, %s1395_s9 }
  0x38   : > { %p1133_p5 = pneg %p1132_p3  ;;  %p1137_p2 = por %p1136_p9, %p1135_p7 }
  0x3a   : > { %p1139_p4 = por %p1138_p1, %p1137_p2 }
  0x3c   : > { %p1140_p6 = pnand %p1139_p4, %p1133_p5 }
  0x3e   : > { %1143 = shalt.err (!%p1140_p6)
}
  0x3f   : > { %s1144_s5 = scalar_lea.vmem %s1401_s28, 128  ;;  %s1266_s7 = smov [#allocation2]  }
  0x40   : > { %p1145_p8 = scmp.ne.s32.totalorder %s1401_s28, %s1144_s5  ;;  %s1149_s26 = sshll.u32 %s1266_s7, 4  ;;  %s1150_s26 = int_to_ptr.vmem [resolvable:$false] %s1149_s26 }
  0x41   : > { %s1151_s8 = scalar_lea.vmem %s1150_s26, 256  ;;  %p1152_p3 = scmp.lt.s32.totalorder %s1401_s28, %s1150_s26 }
  0x42   : > { %p1147_p10 = pnand %p1145_p8, %p1131_p0  ;;  %p1153_p7 = scmp.lt.s32.totalorder %s1151_s8, %s1144_s5 }
  0x44   : > { %p1148_p13 = pneg %p1147_p10  ;;  %p1154_p9 = por %p1153_p7, %p1152_p3 }
  0x46   : > { %p1155_p2 = pnand %p1154_p9, %p1148_p13 }
  0x48   : > { %1158 = shalt.err (!%p1155_p2)
}
  0x49   : > { %1051 = dma.hbm_to_vmem [thread:$0]  (!%p1397_p11), %s1395_s9, 128, %s1401_s28, %s180_s10  }
  0x4a   : > { %p1620_p5 = scmp.ne.s32.totalorder %s1615_s23, 0 }
  0x4b   : > { %s1431_s25 = sand.u32 (!%p1620_p5), 1, %s1253_s16   ;;  %p1621_p0 = scmp.ne.s32.totalorder (!%p1620_p5), %s1613_s21, 0 }
  0x4c   : > { %199 = sbr.rel (%p1620_p5) target bundleno = 379 (0x17b), region = 32  ;;  %s1434_s11 = sshll.u32 (!%p1620_p5), %s1431_s25, 3 }
  0x4d   : > { %s202_s12 = scalar_lea.sflag (!%p1620_p5), [#allocation3], %s1431_s25  ;;  %s205_s13 = scalar_lea.vmem (!%p1620_p5), [#allocation2], %s1434_s11 }
  0x53   : > { %1232 = dma.done.wait (%p1621_p0), %s202_s12, 128  }
  0x54   : > { %1234 = vsyncadd (%p1621_p0), %s202_s12, 4294967168  ;;  %p1622_p11 = scmp.eq.s32.totalorder %s1316_s19, 0 }
  0x56   : > { %1236 = dma.done.wait (%p1622_p11), [#allocation6], 1024   ;;  %p1623_p1 = pmov %p1622_p11 }
  0x57   : > { %v1267_v0 = vmov 0.0   ;;  %v241_v1 = vld [vmem:[#allocation5 + $0x8] sm:$0xff]  ;;  %v243_v2 = vld [vmem:[#allocation5 + $0x18] sm:$0xff]  ;;  %v240_v3 = vld [vmem:[#allocation5] sm:$0xff]  ;;  %vm260_vm0 = vcmask 261120   ;;  %s970_s9 = sshll.u32 %s1316_s19, 7 }
  0x58   : > { %1238 = vsyncadd (%p1623_p1), [#allocation6], 4294966272  ;;  %336 = vmatprep.mubr.f32.mxu1 %v1267_v0  ;;  %621 = vmatprep.mubr.f32.mxu0 %v1267_v0  ;;  %v264_v4 = vand.u32 4294901760, %v241_v1  ;;  %v268_v5 = vand.u32 4294901760, %v243_v2  ;;  %v242_v6 = vld [vmem:[#allocation5 + $0x10] sm:$0xff]  ;;  %v266_v7 = vand.u32 4294901760, %v240_v3  ;;  %s1529_s20 = scalar_lea.hbm %s1608_s3, %s970_s9 }
  0x59   : > { %v245_v8 = vld [vmem:[#allocation5 + $0x28] sm:$0xff]  ;;  %v247_v9 = vld [vmem:[#allocation5 + $0x38] sm:$0xff]  ;;  %v270_v10 = vand.u32 4294901760, %v242_v6  ;;  %v244_v13 = vld [vmem:[#allocation5 + $0x20] sm:$0xff]  ;;  %s231_s28 = scalar_lea.vmem [#allocation7], %s1434_s11  ;;  %s814_s6 = scalar_lea.sflag [#allocation4], %s1431_s25 }
  0x5a   : > { %v272_v11 = vand.u32 4294901760, %v245_v8  ;;  %v276_v12 = vand.u32 4294901760, %v247_v9  ;;  %v246_v14 = vld [vmem:[#allocation5 + $0x30] sm:$0xff]  ;;  %v1448_v16 = vpack.c.bf16 %v268_v5, %v264_v4  ;;  %v1450_v17 = vsub.f32 %v241_v1, %v264_v4  ;;  %s832_s29 = sshll.u32 %s231_s28, 4  ;;  %s1268_s7 = smov [#allocation7]   ;;  %s1531_s29 = int_to_ptr.vmem [resolvable:$true] %s832_s29 }
  0x5b   : > { %v239_v15 = vld [vmem:[%s205_s13] sm:$0xff]  ;;  %v1452_v18 = vsub.f32 %v243_v2, %v268_v5  ;;  %v1454_v19 = vsub.f32 %v240_v3, %v266_v7  ;;  %v1456_v20 = vpack.c.bf16 %v270_v10, %v266_v7  ;;  %v1458_v21 = vsub.f32 %v242_v6, %v270_v10  ;;  %s1159_s5 = scalar_lea.vmem %s1531_s29, 128  ;;  %s1163_s26 = sshll.u32 %s1268_s7, 4  ;;  %s1164_s26 = int_to_ptr.vmem [resolvable:$false] %s1163_s26 }
  0x5c   : > { %v1460_v22 = vpack.c.bf16 %v276_v12, %v272_v11  ;;  %v1462_v23 = vsub.f32 %v245_v8, %v272_v11  ;;  %975 = vmatprep.subr.bf16.mxu1 %v1448_v16  ;;  %999 = vmatprep.subr.bf16.mxu0 %v1448_v16  ;;  %v1466_v24 = vsub.f32 %v247_v9, %v276_v12  ;;  %v274_v25 = vand.u32 4294901760, %v244_v13  ;;  %v248_v12 = vld [vmem:[%s1607_s2] sm:$0x3]  ;;  %p1160_p4 = scmp.ne.s32.totalorder %s1531_s29, %s1159_s5  ;;  %s1165_s8 = scalar_lea.vmem %s1164_s26, 256 }
  0x5d   : > { %v278_v26 = vand.u32 4294901760, %v246_v14  ;;  %v262_v27 = vsel %vm260_vm0, %v239_v15, 0  ;;  %977 = vmatpush1.bf16.msra.mxu1 %v1456_v20  ;;  %1001 = vmatpush1.bf16.msra.mxu0 %v1456_v20  ;;  %v350_v29 = vand.u32 4294901760, %v1450_v17  ;;  %v362_v30 = vand.u32 4294901760, %v1452_v18  ;;  %p1166_p10 = scmp.lt.s32.totalorder %s1531_s29, %s1164_s26  ;;  %p1167_p13 = scmp.lt.s32.totalorder %s1165_s8, %s1159_s5 }
  0x5e   : > { %v1471_v28 = vand.u32 4294901760, %v262_v27  ;;  %v356_v31 = vand.u32 4294901760, %v1454_v19  ;;  %979 = vmatprep.subr.bf16.mxu1 %v1460_v22  ;;  %1003 = vmatprep.subr.bf16.mxu0 %v1460_v22  ;;  %v1480_v33 = vsub.f32 %v244_v13, %v274_v25  ;;  %v368_v35 = vand.u32 4294901760, %v1458_v21  ;;  %p1161_p6 = pnand %p1160_p4, %p1386_p12 }
  0x5f   : > { %v1478_v32 = vpack.c.bf16 %v278_v26, %v274_v25  ;;  %v1482_v34 = vsub.f32 %v246_v14, %v278_v26  ;;  %v351_v37 = vsub.f32 %v1450_v17, %v350_v29  ;;  %v363_v38 = vsub.f32 %v1452_v18, %v362_v30  ;;  %p1168_p3 = por %p1167_p13, %p1166_p10 }
  0x60   : > { %v338_v36 = vsub.f32 %v262_v27, %v1471_v28  ;;  %v1006_v39 = vpack.c.bf16 %v362_v30, %v350_v29  ;;  %v357_v40 = vsub.f32 %v1454_v19, %v356_v31  ;;  %v369_v41 = vsub.f32 %v1458_v21, %v368_v35  ;;  %p1162_p8 = pneg %p1161_p6 }
  0x61   : > { %v1008_v42 = vpack.c.bf16 %v368_v35, %v356_v31  ;;  %v374_v43 = vand.u32 4294901760, %v1462_v23  ;;  %981 = vmatpush1.bf16.msra.mxu1 %v1478_v32  ;;  %1005 = vmatpush1.bf16.msra.mxu0 %v1478_v32  ;;  %v352_v45 = vand.u32 4294901760, %v351_v37  ;;  %v364_v46 = vand.u32 4294901760, %v363_v38 }
  0x62   : > { %v339_v44 = vand.u32 4294901760, %v338_v36  ;;  %v386_v47 = vand.u32 4294901760, %v1466_v24  ;;  %1007 = vmatprep.subr.bf16.mxu0 %v1006_v39  ;;  %v358_v48 = vand.u32 4294901760, %v357_v40  ;;  %v370_v49 = vand.u32 4294901760, %v369_v41  ;;  %p1169_p7 = pnand %p1168_p3, %p1162_p8 }
  0x63   : > { %v375_v50 = vsub.f32 %v1462_v23, %v374_v43  ;;  %v380_v51 = vand.u32 4294901760, %v1480_v33  ;;  %v982_v53 = vpack.c.bf16 %v364_v46, %v352_v45  ;;  %v392_v59 = vand.u32 4294901760, %v1482_v34 }
  0x64   : > { %v340_v52 = vsub.f32 %v338_v36, %v339_v44  ;;  %v387_v54 = vsub.f32 %v1466_v24, %v386_v47  ;;  %v1010_v55 = vpack.c.bf16 %v386_v47, %v374_v43  ;;  %625 = vmatmul.mubr.f32.vlgmr.msra.gmra.mrb[0].mxu0 %v339_v44  ;;  %v984_v56 = vpack.c.bf16 %v370_v49, %v358_v48 }
  0x65   : > { %v376_v57 = vand.u32 4294901760, %v375_v50  ;;  %v381_v58 = vsub.f32 %v1480_v33, %v380_v51  ;;  %983 = vmatprep.subr.bf16.mxu1 %v982_v53  ;;  %1009 = vmatpush1.bf16.msra.mxu0 %v1008_v42  ;;  %v393_v63 = vsub.f32 %v1482_v34, %v392_v59  ;;  %v1012_v1 = vpack.c.bf16 %v392_v59, %v380_v51 }
  0x66   : > { %v341_v60 = vand.u32 4294901760, %v340_v52  ;;  %v388_v61 = vand.u32 4294901760, %v387_v54  ;;  %1011 = vmatprep.subr.bf16.mxu0 %v1010_v55  ;;  %719 = vmatprep.mubr.f32.mxu0 %v1267_v0  ;;  %v990_v4 = vpack.c.bf16 %v1452_v18, %v1450_v17  ;;  %v992_v6 = vpack.c.bf16 %v1458_v21, %v1454_v19 }
  0x67   : > { %v382_v62 = vand.u32 4294901760, %v381_v58  ;;  %v394_v3 = vand.u32 4294901760, %v393_v63  ;;  %v994_v7 = vpack.c.bf16 %v1466_v24, %v1462_v23  ;;  %v996_v8 = vpack.c.bf16 %v1482_v34, %v1480_v33 }
  0x68   : > { %342 = vmatmul.mubr.f32.vlgmr.msra.gmra.mrb[0].mxu1 %v341_v60  ;;  %v986_v2 = vpack.c.bf16 %v388_v61, %v376_v57  ;;  %v250_v9 = vlaneseq }
  0x69   : > { %985 = vmatpush1.bf16.msra.mxu1 %v984_v56  ;;  %452 = vmatprep.mubr.f32.mxu1 %v1267_v0  ;;  %v988_v5 = vpack.c.bf16 %v394_v3, %v382_v62 }
  0x6a   : > { %987 = vmatprep.subr.bf16.mxu1 %v986_v2  ;;  %1013 = vmatpush1.bf16.msra.mxu0 %v1012_v1  ;;  %v251_v10 = vshrl.u32 %v250_v9, 7 }
  0x6b   : > { %1015 = vmatprep.subr.bf16.mxu0 %v1448_v16 }
  0x6c   : > { %v252_v11 = vsub.s32 0, %v251_v10  ;;  %v256_v13 = vsub.s32 1, %v251_v10 }
  0x6d   : > { %989 = vmatpush1.bf16.msra.mxu1 %v988_v5  ;;  %721 = vmatmul.mubr.f32.vlgmr.msra.gmra.mrb[0].mxu0 %v1471_v28 }
  0x6e   : > { %991 = vmatprep.subr.bf16.mxu1 %v990_v4  ;;  %1017 = vmatpush1.bf16.msra.mxu0 %v1456_v20  ;;  %v253_v14 = vrot.slane %v248_v12, %v252_v11  ;;  %v257_v15 = vrot.slane %v248_v12, %v256_v13 }
  0x6f   : > { %1019 = vmatprep.subr.bf16.mxu0 %v1460_v22  ;;  %799 = vmatprep.mubr.f32.mxu0 %v1267_v0 }
  0x70   : > { %454 = vmatmul.mubr.f32.vlgmr.msra.gmra.mrb[0].mxu1 %v1471_v28 }
  0x71   : > { %993 = vmatpush1.bf16.msra.mxu1 %v992_v6  ;;  %540 = vmatprep.mubr.f32.mxu1 %v1267_v0 }
  0x72   : > { %995 = vmatprep.subr.bf16.mxu1 %v994_v7  ;;  %1021 = vmatpush1.bf16.msra.mxu0 %v1478_v32 }
  0x75   : > { %997 = vmatpush1.bf16.msra.mxu1 %v996_v8  ;;  %801 = vmatmul.mubr.f32.vlgmr.msra.gmra.mrb[0].mxu0 %v1471_v28 }
  0x78   : > { %543 = vmatmul.mubr.f32.vlgmr.msra.gmra.mrb[0].mxu1 %v338_v36 }
 0x148   : > { %v802_v0 = vpop.f32.mrb[0].mxu0 }
 0x149   : > { %v804_v16 = vpop.f32.mrb[1].mxu0 }
 0x14b   : > { %v544_v17 = vpop.f32.mrb[0].mxu1 }
 0x14c   : > { %v1022_v18 = vadd.f32 %v544_v17, %v253_v14  ;;  %v546_v19 = vpop.f32.mrb[1].mxu1 }
 0x14d   : > { %v1024_v20 = vadd.f32 %v546_v19, %v257_v15 }
 0x14e   : > { %v1023_v21 = vadd.f32 %v1022_v18, %v802_v0 }
 0x14f   : > { %v1025_v22 = vadd.f32 %v1024_v20, %v804_v16 }
 0x150   : > { %807 = vst [vmem:[%s231_s28] sm:$0xff] %v1023_v21 }
 0x151   : > { %v808_v23 = vmul.f32 0.5, %v1025_v22 }
 0x152   : > { %1172 = shalt.err (!%p1169_p7)
}
 0x153   : > { %s1173_s12 = scalar_lea.hbm %s1529_s20, 128  ;;  %s1177_s23 = scalar_lea.hbm %s1608_s3, 256 }
 0x154   : > { %p1174_p9 = scmp.ne.s32.totalorder %s1529_s20, %s1173_s12  ;;  %p1178_p0 = scmp.lt.u32.totalorder %s1529_s20, %s1608_s3 }
 0x155   : > { %p1179_p11 = scmp.lt.u32.totalorder %s1177_s23, %s1173_s12  ;;  %p1181_p4 = scmp.lt.u32.totalorder %s1173_s12, %s1529_s20 }
 0x156   : > { %p1175_p2 = pnand %p1174_p9, %p1386_p12 }
 0x157   : > { %p1180_p1 = por %p1179_p11, %p1178_p0 }
 0x158   : > { %p1176_p5 = pneg %p1175_p2 }
 0x159   : > { %p1182_p6 = por %p1181_p4, %p1180_p1 }
 0x15b   : > { %p1183_p8 = pnand %p1182_p6, %p1176_p5 }
 0x15d   : > { %1186 = shalt.err (!%p1183_p8)
}
 0x15e   : > { %1040 = dma.vmem_to_hbm [thread:$0]  (%p1386_p12), %s1531_s29, 128, %s1529_s20, %s814_s6   ;;  %1099 = vtanh.f32 %v808_v23 }
 0x15f   : > { %s238_s14 = scalar_lea.vmem [#allocation8], %s1434_s11  ;;  %s1561_s8 = scalar_lea.hbm %s1609_s4, %s970_s9 }
 0x160   : > { %s845_s5 = sshll.u32 %s238_s14, 4  ;;  %s819_s12 = scalar_lea.sflag [#allocation9], %s1431_s25  ;;  %s1563_s5 = int_to_ptr.vmem [resolvable:$true] %s845_s5 }
 0x161   : > { %s1187_s29 = scalar_lea.vmem %s1563_s5, 128  ;;  %s1269_s11 = smov [#allocation8]  }
 0x162   : > { %p1188_p10 = scmp.ne.s32.totalorder %s1563_s5, %s1187_s29  ;;  %s1191_s20 = sshll.u32 %s1269_s11, 4  ;;  %s1192_s20 = int_to_ptr.vmem [resolvable:$false] %s1191_s20 }
 0x163   : > { %s1193_s19 = scalar_lea.vmem %s1192_s20, 256  ;;  %p1194_p7 = scmp.lt.s32.totalorder %s1563_s5, %s1192_s20 }
 0x164   : > { %p1189_p13 = pnand %p1188_p10, %p1386_p12  ;;  %p1195_p9 = scmp.lt.s32.totalorder %s1193_s19, %s1187_s29 }
 0x166   : > { %p1190_p3 = pneg %p1189_p13  ;;  %p1196_p2 = por %p1195_p9, %p1194_p7 }
 0x168   : > { %v1100_v24 = vpop.eup %1099  ;;  %p1197_p5 = pnand %p1196_p2, %p1190_p3 }
 0x169   : > { %v810_v25 = vadd.f32 1.0, %v1100_v24 }
 0x16b   : > { %v811_v26 = vmul.f32 0.5, %v810_v25 }
 0x16d   : > { %812 = vst [vmem:[%s238_s14] sm:$0xff] %v811_v26 }
 0x16e   : > { %1200 = shalt.err (!%p1197_p5)
}
 0x16f   : > { %s1201_s25 = scalar_lea.hbm %s1561_s8, 128  ;;  %s1205_s13 = scalar_lea.hbm %s1609_s4, 256 }
 0x170   : > { %p1202_p0 = scmp.ne.s32.totalorder %s1561_s8, %s1201_s25  ;;  %p1206_p4 = scmp.lt.u32.totalorder %s1561_s8, %s1609_s4 }
 0x171   : > { %p1207_p6 = scmp.lt.u32.totalorder %s1205_s13, %s1201_s25  ;;  %p1209_p10 = scmp.lt.u32.totalorder %s1201_s25, %s1561_s8 }
 0x172   : > { %p1203_p11 = pnand %p1202_p0, %p1386_p12 }
 0x173   : > { %p1208_p8 = por %p1207_p6, %p1206_p4 }
 0x174   : > { %p1204_p1 = pneg %p1203_p11 }
 0x175   : > { %p1210_p13 = por %p1209_p10, %p1208_p8 }
 0x177   : > { %p1211_p3 = pnand %p1210_p13, %p1204_p1 }
 0x179   : > { %1214 = shalt.err (!%p1211_p3)
}
 0x17a   : > { %1041 = dma.vmem_to_hbm [thread:$0]  (%p1386_p12), %s1563_s5, 128, %s1561_s8, %s819_s12  }
 0x17b PF: > { %s857_s28 = sand.u32 1, %s1249_s15   ;;  %p1624_p7 = scmp.ne.s32.totalorder %s1614_s22, 0 }
 0x17c   : > { %p1625_p9 = scmp.ge.s32.totalorder %s1261_s18, 2  ;;  %s858_s10 = scalar_lea.sflag [#allocation4], %s857_s28 }
 0x17e   : > { %p1053_p2 = pnand %p1625_p9, %p1624_p7 }
 0x180   : > { %1240 = dma.done.wait (!%p1053_p2), %s858_s10, 128  }
 0x181   : > { %1242 = vsyncadd (!%p1053_p2), %s858_s10, 4294967168  ;;  %s867_s14 = scalar_lea.sflag [#allocation9], %s857_s28 }
 0x182   : > { %1244 = dma.done.wait (!%p1053_p2), %s867_s14, 128  }
 0x183   : > { %1246 = vsyncadd (!%p1053_p2), %s867_s14, 4294967168  ;;  %p22_p12 = scmp.ge.s32.totalorder %s1351_s27, 4   ;;  %s1626_s15 = smov %s1253_s16 }
 0x184   : > { %s1627_s16 = smov %s1257_s17  ;;  %s1628_s17 = smov %s1382_s24 }
 0x185   : > { %s1629_s18 = smov %s1351_s27  ;;  %24 = sbr.rel (!%p22_p12) target bundleno = 8 (0x8), region = 98 }
 0x18c   :  { %872 = vsyncpa [#allocation3], 1 }
 0x18d   :  { %874 = vsyncpa [#allocation3 + $0x1], 1 }
 0x18e   :  { %875 = vsyncpa [#allocation6], 1 }
 0x18f   :  { %876 = vsyncpa [#allocation4], 1 }
 0x190   :  { %878 = vsyncpa [#allocation4 + $0x1], 1 }
 0x191   :  { %879 = vsyncpa [#allocation9], 1 }
 0x192   :  { %881 = vsyncpa [#allocation9 + $0x1], 1 }

</bundles_post_ra>
